<compile_context>
chip_gen: v7x
topology: tpu7x:2x2x1
jax: 0.10.0
libtpu: 0.0.40
codegen_flags: <defaults>
</compile_context>

<pallas_src>
import functools
import math

import jax
import jax.numpy as jnp
from jax.experimental import pallas as pl
from jax.experimental.pallas import tpu as pltpu


# ----------------------------- kernels ------------------------------------


def _row_normalize_kernel(x_ref, out_ref):
    """out = row-L2-normalized x, cast to out dtype (bf16 for MXU feeding)."""
    x = x_ref[...].astype(jnp.float32)
    # F.normalize(p=2, dim=1, eps=1e-12): v / max(||v||, 1e-12)
    #   == v * rsqrt(max(sum(v*v), 1e-24))  (EUP rsqrt + VPU multiply)
    inv = jax.lax.rsqrt(jnp.maximum(jnp.sum(x * x, axis=-1, keepdims=True), 1e-24))
    out_ref[...] = (x * inv).astype(out_ref.dtype)


def _cosine_logits_kernel(xn_ref, wn_ref, out_ref):
    """No-label path: plain cosine logits = xn @ wn.T (bf16 in, f32 acc)."""
    out_ref[...] = jax.lax.dot_general(
        xn_ref[...], wn_ref[...], (((1,), (1,)), ((), ())),
        preferred_element_type=jnp.float32,
    ).astype(out_ref.dtype)


def _sphereface_margin_kernel(label_ref, xn_ref, wn_ref, out_ref, *, s, m):
    """Label path: cosine logits + angular margin on the target column only."""
    logits = jax.lax.dot_general(
        xn_ref[...], wn_ref[...], (((1,), (1,)), ((), ())),
        preferred_element_type=jnp.float32,
    )                                                    # (tb, tc) f32

    tc = out_ref.shape[-1]
    label = label_ref[...]                               # (tb, 1) int32
    col = (jax.lax.broadcasted_iota(jnp.int32, logits.shape, 1)
           + pl.program_id(1) * tc)                      # global class index
    one_hot = col == label                               # (tb, tc) bool

    # Margin only on the target column: tb transcendentals per tile, not tb*tc.
    # If this tile doesn't contain the label, tgt=0 and the result is unused.
    tgt = jnp.sum(jnp.where(one_hot, logits, 0.0), axis=-1, keepdims=True)
    theta = jnp.arccos(jnp.clip(tgt, -1.0 + 1e-7, 1.0 - 1e-7))
    tgt_cos = jnp.cos(m * theta)                         # (tb, 1)

    out = jnp.where(one_hot, tgt_cos, logits) * s
    out_ref[...] = out.astype(out_ref.dtype)


# ----------------------------- wrappers ------------------------------------


def _round_tile(dim, pref, align):
    """Largest legal tile <= pref: full dim if it fits, else a multiple of align."""
    if dim <= pref:
        return dim
    return max(align, (pref // align) * align)


_VMEM_LIMIT = int(32 * 2**20)   # fits v5e/v6e and v7x's 32 MiB scoped budget


def _normalize_rows(x, out_dtype=jnp.bfloat16, row_tile=256):
    R, D = x.shape
    tr = _round_tile(R, row_tile, 8)
    return pl.pallas_call(
        _row_normalize_kernel,
        out_shape=jax.ShapeDtypeStruct((R, D), out_dtype),
        grid_spec=pltpu.PrefetchScalarGridSpec(
            num_scalar_prefetch=0,
            grid=(pl.cdiv(R, tr),),
            in_specs=[pl.BlockSpec((tr, D), lambda i: (i, 0))],
            out_specs=pl.BlockSpec((tr, D), lambda i: (i, 0)),
        ),
        compiler_params=pltpu.CompilerParams(
            dimension_semantics=("parallel",),
            vmem_limit_bytes=_VMEM_LIMIT,
        ),
    )(x)


def sphereface_forward(x, weight, label=None, *, s=30.0, m=1.35,
                       block_b=128, block_c=512, dot_dtype=jnp.bfloat16):
    """Pallas implementation of SphereFace.forward.

    x:      (B, num_features) float32
    weight: (num_classes, num_features) float32
    label:  optional (B,) int labels
    """
    B, D = x.shape
    C, D2 = weight.shape
    assert D == D2, "feature dims of x and weight must match"

    # Hoisted row normalization (W-norm computed once, not per batch tile),
    # emitted in bf16 so the matmul kernel reads half the HBM bytes.
    xn = _normalize_rows(x, dot_dtype)
    wn = _normalize_rows(weight, dot_dtype)

    tb = _round_tile(B, block_b, 8)      # batch tile  (sublane multiple)
    tc = _round_tile(C, block_c, 128)    # class tile  (lane-dense stores)
    grid = (pl.cdiv(B, tb), pl.cdiv(C, tc))

    x_spec = pl.BlockSpec((tb, D), lambda i, j: (i, 0))
    w_spec = pl.BlockSpec((tc, D), lambda i, j: (j, 0))
    o_spec = pl.BlockSpec((tb, tc), lambda i, j: (i, j))
    cparams = pltpu.CompilerParams(
        dimension_semantics=("parallel", "parallel"),
        vmem_limit_bytes=_VMEM_LIMIT,
    )

    if label is None:
        return pl.pallas_call(
            _cosine_logits_kernel,
            out_shape=jax.ShapeDtypeStruct((B, C), jnp.float32),
            grid_spec=pltpu.PrefetchScalarGridSpec(
                num_scalar_prefetch=0, grid=grid,
                in_specs=[x_spec, w_spec], out_specs=o_spec),
            compiler_params=cparams,
        )(xn, wn)

    label2d = jnp.asarray(label).reshape(B, 1).astype(jnp.int32)
    l_spec = pl.BlockSpec((tb, 1), lambda i, j: (i, 0))
    kernel = functools.partial(_sphereface_margin_kernel, s=float(s), m=float(m))
    return pl.pallas_call(
        kernel,
        out_shape=jax.ShapeDtypeStruct((B, C), jnp.float32),
        grid_spec=pltpu.PrefetchScalarGridSpec(
            num_scalar_prefetch=0, grid=grid,
            in_specs=[l_spec, x_spec, w_spec], out_specs=o_spec),
        compiler_params=cparams,
    )(label2d, xn, wn)


# ----------------------------- reference -----------------------------------


def _reference_forward(x, weight, label=None, *, s=30.0, m=1.35,
                       dot_dtype=jnp.float32):
    def norm(v):
        v = v.astype(jnp.float32)
        inv = jax.lax.rsqrt(jnp.maximum(jnp.sum(v * v, -1, keepdims=True), 1e-24))
        return (v * inv).astype(dot_dtype)

    xn, wn = norm(x), norm(weight)
    logits = jax.lax.dot_general(
        xn, wn, (((1,), (1,)), ((), ())), preferred_element_type=jnp.float32)
    if label is None:
        return logits
    theta = jnp.arccos(jnp.clip(logits, -1.0 + 1e-7, 1.0 - 1e-7))
    target = jnp.cos(m * theta)
    one_hot = jax.nn.one_hot(label, logits.shape[1], dtype=jnp.float32)
    return (logits * (1.0 - one_hot) + target * one_hot) * s


# ----------------------------- self-test ------------------------------------


if __name__ == "__main__":
    B, D, C = 8, 32, 16   # batch, num_features, num_classes
    s_param, m_param = 30.0, 1.35

    key = jax.random.PRNGKey(0)
    kx, kw, kl = jax.random.split(key, 3)

    x = jax.random.normal(kx, (B, D), dtype=jnp.float32)
    # xavier_uniform_ for a (C, D) matrix: bound = sqrt(6 / (fan_in + fan_out))
    bound = math.sqrt(6.0 / (D + C))
    weight = jax.random.uniform(kw, (C, D), jnp.float32, -bound, bound)
    label = jax.random.randint(kl, (B,), 0, C)

    # ---- path with labels (margin applied) ----
    out = jax.block_until_ready(
        sphereface_forward(x, weight, label, s=s_param, m=m_param))
    assert out.shape == (B, C)

    # matched-precision reference (bf16 MXU inputs, f32 accumulation)
    ref_bf16 = _reference_forward(x, weight, label, s=s_param, m=m_param,
                                  dot_dtype=jnp.bfloat16)
    assert jnp.allclose(out, ref_bf16, atol=1e-4, rtol=1e-4), "margin path mismatch"

    # full-f32 (PyTorch-equivalent) reference: loose tol bounds the bf16
    # MXU-input quantization after the x30 scale.
    ref_f32 = _reference_forward(x, weight, label, s=s_param, m=m_param)
    assert jnp.allclose(out, ref_f32, atol=3e-1), "margin path far from f32 reference"

    # ---- path without labels (plain cosine logits, no scale) ----
    logits = jax.block_until_ready(sphereface_forward(x, weight, None))
    logits_ref = _reference_forward(x, weight, None, dot_dtype=jnp.bfloat16)
    assert jnp.allclose(logits, logits_ref, atol=1e-4, rtol=1e-4), "logits mismatch"

    print("KERNEL_OK")
</pallas_src>

<mosaic_0001>
module attributes {stable_mosaic.version = 11 : i64} {
  func.func @_row_normalize_kernel(%arg0: i32, %arg1: memref<8x32xf32, #tpu.memory_space<vmem>>, %arg2: memref<8x32xbf16, #tpu.memory_space<vmem>>) attributes {dimension_semantics = [#tpu.dimension_semantics<parallel>], iteration_bounds = array<i64: 1>, scalar_prefetch = 0 : i64, scratch_operands = 0 : i64, tpu.core_type = #tpu.core_type<tc>, window_params = [{transform_indices = @transform_0, window_bounds = array<i64: 8, 32>}, {transform_indices = @transform_1, window_bounds = array<i64: 8, 32>}]} {
    %c0 = arith.constant 0 : index
    %c0_0 = arith.constant 0 : index
    %0 = vector.load %arg1[%c0, %c0_0] : memref<8x32xf32, #tpu.memory_space<vmem>>, vector<8x32xf32>
    %1 = arith.mulf %0, %0 : vector<8x32xf32>
    %cst = arith.constant dense<0.000000e+00> : vector<8xf32>
    %2 = vector.multi_reduction <add>, %1, %cst [1] : vector<8x32xf32> to vector<8xf32>
    %3 = vector.shape_cast %2 : vector<8xf32> to vector<8x1xf32>
    %cst_1 = arith.constant 1.000000e-24 : f32
    %4 = vector.broadcast %cst_1 : f32 to vector<8x1xf32>
    %5 = arith.maximumf %3, %4 : vector<8x1xf32>
    %6 = math.rsqrt %5 : vector<8x1xf32>
    %7 = vector.broadcast %6 : vector<8x1xf32> to vector<8x32xf32>
    %8 = arith.mulf %0, %7 : vector<8x32xf32>
    %9 = arith.truncf %8 : vector<8x32xf32> to vector<8x32xbf16>
    %c0_2 = arith.constant 0 : index
    %c0_3 = arith.constant 0 : index
    %10 = vector.load %arg2[%c0_2, %c0_3] : memref<8x32xbf16, #tpu.memory_space<vmem>>, vector<8x32xbf16>
    tpu.vector_store %arg2[%c0_2, %c0_3], %9 {strides = array<i32>} : memref<8x32xbf16, #tpu.memory_space<vmem>>, vector<8x32xbf16>,
    return
  }
  func.func @transform_0(%arg0: i32) -> (i32, i32) {
    %c0_i32 = arith.constant 0 : i32
    %c0_i32_0 = arith.constant 0 : i32
    return %arg0, %c0_i32 : i32, i32
  }
  func.func @transform_1(%arg0: i32) -> (i32, i32) {
    %c0_i32 = arith.constant 0 : i32
    %c0_i32_0 = arith.constant 0 : i32
    return %arg0, %c0_i32 : i32, i32
  }
}

</mosaic_0001>

<bundles_post_ra>
// kernel: tpu_custom_call.1
= control target key start
LH: loop header
LB: loop body
LE: loop exit
PB: predicated region body
PF: predicated region fallthrough
CT: control target
= control target key end

     0   :  { %6 = vsyncpa [#allocation3], 0  ;;  %s136_s0 = inlined_call_operand.hbm [shape: f32[8,32], index: 0, kind: input, shape index: {}]   ;;  %s137_s1 = inlined_call_operand.hbm [shape: bf16[8,32], index: 1, kind: output, shape index: {}]  }
   0x1   :  { %7 = vsyncpa [#allocation4], 0  ;;  %s100_s6 = smov [#allocation2]   ;;  %s52_s10 = scalar_lea.hbm %s136_s0, 128 }
   0x2   :  { %s14_s7 = sshll.u32 %s100_s6, 4  ;;  %p53_p0 = scmp.ne.s32.totalorder %s136_s0, %s52_s10  ;;  %s15_s7 = int_to_ptr.vmem [resolvable:$true] %s14_s7 }
   0x3   :  { %p56_p1 = scmp.lt.u32.totalorder %s52_s10, %s136_s0 }
   0x5   :  { %p58_p2 = pnand %p56_p1, %p53_p0 }
   0x7   :  { %61 = shalt.err (!%p58_p2)
}
   0x8   :  { %s62_s15 = scalar_lea.vmem %s15_s7, 128  ;;  %p67_p4 = scmp.lt.s32.totalorder %s15_s7, %s15_s7 }
   0x9   :  { %p63_p3 = scmp.ne.s32.totalorder %s15_s7, %s62_s15  ;;  %p68_p5 = scmp.lt.s32.totalorder %s62_s15, %s62_s15 }
   0xb   :  { %p69_p6 = por %p68_p5, %p67_p4 }
   0xd   :  { %p70_p7 = pnand %p69_p6, %p63_p3 }
   0xf   :  { %73 = shalt.err (!%p70_p7)
}
  0x10   :  { %17 = dma.hbm_to_vmem [thread:$0]  %s136_s0, 128, %s15_s7, [#allocation3]  }
  0x11   :  { %96 = dma.done.wait [#allocation3], 128  }
  0x12   :  { %97 = vsyncadd [#allocation3], 4294967168  ;;  %v21_v0 = vld [vmem:[#allocation2] sm:$0xff]  ;;  %vm23_vm0 = vcmask 261120   ;;  %s101_s18 = smov [#allocation5]   ;;  %vm31_vm1 = vcmask 257024  }
  0x13   :  { %v22_v1 = vmul.f32 %v21_v0, %v21_v0  ;;  %s39_s19 = sshll.u32 %s101_s18, 4  ;;  %s40_s19 = int_to_ptr.vmem [resolvable:$true] %s39_s19 }
  0x14   :  { %s74_s20 = scalar_lea.vmem %s40_s19, 64  ;;  %p79_p9 = scmp.lt.s32.totalorder %s40_s19, %s40_s19 }
  0x15   :  { %v24_v2 = vsel %vm23_vm0, %v22_v1, 0.0  ;;  %p75_p8 = scmp.ne.s32.totalorder %s40_s19, %s74_s20  ;;  %p80_p10 = scmp.lt.s32.totalorder %s74_s20, %s74_s20 }
  0x16   :  { %25 = vadd.xlane.f32.xlu0 %v24_v2 }
  0x17   :  { %p81_p11 = por %p80_p10, %p79_p9 }
  0x19   :  { %p82_p12 = pnand %p81_p11, %p75_p8 }
  0xa3   :  { %v26_v3 = vpop.xlane.xlu0 %25 }
  0xa4   :  { %v27_v4 = vmax.f32 %v26_v3, 1e-24 }
  0xa6   :  { %50 = vrsqrt.f32 %v27_v4 }
  0xb0   :  { %v51_v5 = vpop.eup %50 }
  0xb1   :  { %v29_v6 = vmul.f32 %v51_v5, %v21_v0 }
  0xb3   :  { %v30_v7 = vpack.c.bf16 %v29_v6, %v29_v6 }
  0xb5   :  { %32 = vst.msk [vmem:[#allocation5] sm:$0xf] %vm31_vm1, %v30_v7 }
  0xb6   :  { %85 = shalt.err (!%p82_p12)
}
  0xb7   :  { %s86_s22 = scalar_lea.hbm %s137_s1, 64 }
  0xb8   :  { %p87_p13 = scmp.ne.s32.totalorder %s137_s1, %s86_s22  ;;  %p90_p0 = scmp.lt.u32.totalorder %s86_s22, %s137_s1 }
  0xba   :  { %p92_p1 = pnand %p90_p0, %p87_p13 }
  0xbc   :  { %95 = shalt.err (!%p92_p1)
}
  0xbd   :  { %42 = dma.vmem_to_hbm [thread:$0]  %s40_s19, 64, %s137_s1, [#allocation4]  }
  0xbe   :  { %98 = dma.done.wait [#allocation4], 64  }
  0xbf   :  { %99 = vsyncadd [#allocation4], 4294967232 }
  0xc0   :  { %46 = vsyncpa [#allocation3], 1 }
  0xc1   :  { %47 = vsyncpa [#allocation4], 1 }

</bundles_post_ra>
